<compile_context>
chip_gen: v7x
topology: tpu7x:2x2x1
jax: 0.10.0
libtpu: 0.0.40
codegen_flags: <defaults>
</compile_context>

<pallas_src>
import jax
import jax.numpy as jnp
from jax.experimental import pallas as pl
from jax.experimental.pallas import tpu as pltpu


def mlp_kernel(x_ref, w1_ref, b1_ref, w2_ref, b2_ref, o_ref):
    # f32 tile read from HBM; cast to bf16 on the VPU (free slot) for the MXU.
    x = x_ref[...].astype(jnp.bfloat16)                 # (tm, F) bf16
    h = jnp.dot(x, w1_ref[...],
                preferred_element_type=jnp.float32)      # MXU, f32 accumulate
    h = jnp.maximum(h + b1_ref[...], 0.0)                # f32 bias + ReLU (VPU)
    y = jnp.dot(h.astype(jnp.bfloat16), w2_ref[...],
                preferred_element_type=jnp.float32)      # (tm, n_classes) f32
    o_ref[...] = (y + b2_ref[...]).astype(o_ref.dtype)   # narrow, dense store


def prepare_params(w1, b1, w2, b2):
    """One-time parameter prep (hoisted out of the per-call forward)."""
    w1_bf = w1.astype(jnp.bfloat16)
    w2_bf = w2.astype(jnp.bfloat16)
    b1_f = b1.astype(jnp.float32).reshape(1, -1)
    b2_f = b2.astype(jnp.float32).reshape(1, -1)
    return w1_bf, b1_f, w2_bf, b2_f


def _round_up(x, m):
    return ((x + m - 1) // m) * m


def dummy_model_forward(x, w1_bf, b1, w2_bf, b2, *, tile_m=8192):
    batch, n_features = x.shape
    hidden = w1_bf.shape[1]
    n_classes = w2_bf.shape[1]

    # Batch tile selection:
    #  * small batches: one tile covering the whole batch (tm == full dim is
    #    always a legal block shape).
    #  * large batches: multiples of 512, capped at tile_m, and split so that
    #    grid_m >= 2 (keeps v7x's second TensorCore busy; harmless on v5e/v6e).
    if batch <= 512:
        tm = batch
    else:
        tm = min(tile_m, _round_up(pl.cdiv(batch, 2), 512))
    grid_m = pl.cdiv(batch, tm)

    flops = 2 * batch * (n_features * hidden + hidden * n_classes)
    bytes_accessed = (batch * n_features * 4          # x (f32 in)
                      + w1_bf.size * 2 + b1.size * 4  # weights/biases (resident)
                      + w2_bf.size * 2 + b2.size * 4
                      + batch * n_classes * 4)        # logits (f32 out)

    out = pl.pallas_call(
        mlp_kernel,
        out_shape=jax.ShapeDtypeStruct((batch, n_classes), jnp.float32),
        grid_spec=pltpu.PrefetchScalarGridSpec(
            num_scalar_prefetch=0,
            grid=(grid_m,),
            in_specs=[
                pl.BlockSpec((tm, n_features), lambda i: (i, 0)),      # x tile
                pl.BlockSpec((n_features, hidden), lambda i: (0, 0)),  # W1 resident
                pl.BlockSpec((1, hidden), lambda i: (0, 0)),           # b1 resident
                pl.BlockSpec((hidden, n_classes), lambda i: (0, 0)),   # W2 resident
                pl.BlockSpec((1, n_classes), lambda i: (0, 0)),        # b2 resident
            ],
            out_specs=pl.BlockSpec((tm, n_classes), lambda i: (i, 0)),
        ),
        compiler_params=pltpu.CompilerParams(
            dimension_semantics=("parallel",),   # independent batch tiles
        ),
        cost_estimate=pl.CostEstimate(
            flops=flops, transcendentals=0, bytes_accessed=bytes_accessed),
    )(x, w1_bf, b1, w2_bf, b2)

    return out


def init_params(key, n_features=32, hidden=64, n_classes=2):
    # Deterministic init mimicking torch.nn.Linear default: U(-1/sqrt(fan_in), 1/sqrt(fan_in))
    k1, k2, k3, k4 = jax.random.split(key, 4)
    bound1 = 1.0 / jnp.sqrt(n_features)
    bound2 = 1.0 / jnp.sqrt(hidden)
    w1 = jax.random.uniform(k1, (n_features, hidden), jnp.float32, -bound1, bound1)
    b1 = jax.random.uniform(k2, (1, hidden), jnp.float32, -bound1, bound1)
    w2 = jax.random.uniform(k3, (hidden, n_classes), jnp.float32, -bound2, bound2)
    b2 = jax.random.uniform(k4, (1, n_classes), jnp.float32, -bound2, bound2)
    return w1, b1, w2, b2


if __name__ == "__main__":
    n_features, hidden, n_classes = 32, 64, 2
    batch = 8

    key = jax.random.PRNGKey(0)
    kx, kp = jax.random.split(key)
    x = jax.random.normal(kx, (batch, n_features), jnp.float32)
    w1, b1, w2, b2 = init_params(kp, n_features, hidden, n_classes)

    # One-time parameter prep (bf16 casts) hoisted out of the forward call.
    w1_bf, b1_f, w2_bf, b2_f = prepare_params(w1, b1, w2, b2)

    out = dummy_model_forward(x, w1_bf, b1_f, w2_bf, b2_f)
    out = jax.block_until_ready(out)

    # Reference check in plain JAX (f32). Matmuls go through bf16 MXU inputs
    # with f32 accumulation => loosened tolerance vs a pure-f32 path.
    ref = jnp.maximum(x @ w1 + b1, 0.0) @ w2 + b2
    assert out.shape == (batch, n_classes)
    assert jnp.allclose(out, ref, atol=3e-2, rtol=3e-2), (
        f"max abs err {jnp.max(jnp.abs(out - ref))}")

    print("KERNEL_OK")
</pallas_src>

<mosaic_0001>
module attributes {stable_mosaic.version = 11 : i64} {
  func.func @mlp_kernel(%arg0: i32, %arg1: memref<8x32xf32, #tpu.memory_space<vmem>>, %arg2: memref<32x64xbf16, #tpu.memory_space<vmem>>, %arg3: memref<1x64xf32, #tpu.memory_space<vmem>>, %arg4: memref<64x2xbf16, #tpu.memory_space<vmem>>, %arg5: memref<1x2xf32, #tpu.memory_space<vmem>>, %arg6: memref<8x2xf32, #tpu.memory_space<vmem>>) attributes {dimension_semantics = [#tpu.dimension_semantics<parallel>], iteration_bounds = array<i64: 1>, scalar_prefetch = 0 : i64, scratch_operands = 0 : i64, tpu.core_type = #tpu.core_type<tc>, window_params = [{transform_indices = @transform_0, window_bounds = array<i64: 8, 32>}, {pipeline_mode = #tpu.pipeline_mode<synchronous>, transform_indices = @transform_1, window_bounds = array<i64: 32, 64>}, {pipeline_mode = #tpu.pipeline_mode<synchronous>, transform_indices = @transform_2, window_bounds = array<i64: 1, 64>}, {pipeline_mode = #tpu.pipeline_mode<synchronous>, transform_indices = @transform_3, window_bounds = array<i64: 64, 2>}, {pipeline_mode = #tpu.pipeline_mode<synchronous>, transform_indices = @transform_4, window_bounds = array<i64: 1, 2>}, {transform_indices = @transform_5, window_bounds = array<i64: 8, 2>}]} {
    %c0 = arith.constant 0 : index
    %c0_0 = arith.constant 0 : index
    %0 = vector.load %arg1[%c0, %c0_0] : memref<8x32xf32, #tpu.memory_space<vmem>>, vector<8x32xf32>
    %1 = arith.truncf %0 : vector<8x32xf32> to vector<8x32xbf16>
    %c0_1 = arith.constant 0 : index
    %c0_2 = arith.constant 0 : index
    %2 = vector.load %arg2[%c0_1, %c0_2] : memref<32x64xbf16, #tpu.memory_space<vmem>>, vector<32x64xbf16>
    %cst = arith.constant dense<0.000000e+00> : vector<8x64xf32>
    %3 = tpu.matmul %1, %2, %cst {dimension_numbers = #tpu.dot_dimension_numbers<[1], [0], [0], [1], [0, 0, 1, 1], [], []>} : vector<8x32xbf16>, vector<32x64xbf16>, vector<8x64xf32> -> vector<8x64xf32>
    %c0_3 = arith.constant 0 : index
    %c0_4 = arith.constant 0 : index
    %4 = vector.load %arg3[%c0_3, %c0_4] : memref<1x64xf32, #tpu.memory_space<vmem>>, vector<1x64xf32>
    %5 = vector.broadcast %4 : vector<1x64xf32> to vector<8x64xf32>
    %6 = arith.addf %3, %5 : vector<8x64xf32>
    %cst_5 = arith.constant 0.000000e+00 : f32
    %7 = vector.broadcast %cst_5 : f32 to vector<8x64xf32>
    %8 = arith.maximumf %6, %7 : vector<8x64xf32>
    %9 = arith.truncf %8 : vector<8x64xf32> to vector<8x64xbf16>
    %c0_6 = arith.constant 0 : index
    %c0_7 = arith.constant 0 : index
    %10 = vector.load %arg4[%c0_6, %c0_7] : memref<64x2xbf16, #tpu.memory_space<vmem>>, vector<64x2xbf16>
    %cst_8 = arith.constant dense<0.000000e+00> : vector<8x2xf32>
    %11 = tpu.matmul %9, %10, %cst_8 {dimension_numbers = #tpu.dot_dimension_numbers<[1], [0], [0], [1], [0, 0, 1, 1], [], []>} : vector<8x64xbf16>, vector<64x2xbf16>, vector<8x2xf32> -> vector<8x2xf32>
    %c0_9 = arith.constant 0 : index
    %c0_10 = arith.constant 0 : index
    %12 = vector.load %arg5[%c0_9, %c0_10] : memref<1x2xf32, #tpu.memory_space<vmem>>, vector<1x2xf32>
    %13 = vector.broadcast %12 : vector<1x2xf32> to vector<8x2xf32>
    %14 = arith.addf %11, %13 : vector<8x2xf32>
    %c0_11 = arith.constant 0 : index
    %c0_12 = arith.constant 0 : index
    %15 = vector.load %arg6[%c0_11, %c0_12] : memref<8x2xf32, #tpu.memory_space<vmem>>, vector<8x2xf32>
    tpu.vector_store %arg6[%c0_11, %c0_12], %14 {strides = array<i32>} : memref<8x2xf32, #tpu.memory_space<vmem>>, vector<8x2xf32>,
    return
  }
  func.func @transform_0(%arg0: i32) -> (i32, i32) {
    %c0_i32 = arith.constant 0 : i32
    %c0_i32_0 = arith.constant 0 : i32
    return %arg0, %c0_i32 : i32, i32
  }
  func.func @transform_1(%arg0: i32) -> (i32, i32) {
    %c0_i32 = arith.constant 0 : i32
    %c0_i32_0 = arith.constant 0 : i32
    %c0_i32_1 = arith.constant 0 : i32
    return %c0_i32, %c0_i32_0 : i32, i32
  }
  func.func @transform_2(%arg0: i32) -> (i32, i32) {
    %c0_i32 = arith.constant 0 : i32
    %c0_i32_0 = arith.constant 0 : i32
    %c0_i32_1 = arith.constant 0 : i32
    return %c0_i32, %c0_i32_0 : i32, i32
  }
  func.func @transform_3(%arg0: i32) -> (i32, i32) {
    %c0_i32 = arith.constant 0 : i32
    %c0_i32_0 = arith.constant 0 : i32
    %c0_i32_1 = arith.constant 0 : i32
    return %c0_i32, %c0_i32_0 : i32, i32
  }
  func.func @transform_4(%arg0: i32) -> (i32, i32) {
    %c0_i32 = arith.constant 0 : i32
    %c0_i32_0 = arith.constant 0 : i32
    %c0_i32_1 = arith.constant 0 : i32
    return %c0_i32, %c0_i32_0 : i32, i32
  }
  func.func @transform_5(%arg0: i32) -> (i32, i32) {
    %c0_i32 = arith.constant 0 : i32
    %c0_i32_0 = arith.constant 0 : i32
    return %arg0, %c0_i32 : i32, i32
  }
}

</mosaic_0001>

<bundles_post_ra>
// kernel: tpu_custom_call.1
= control target key start
LH: loop header
LB: loop body
LE: loop exit
PB: predicated region body
PF: predicated region fallthrough
CT: control target
= control target key end

     0   :  { %v227_v0 = vmov 0.0   ;;  %vm228_vm0 = vmmov 0   ;;  %vm46_vm1 = vcmask 261120   ;;  %vm131_vm2 = vcmask 523264   ;;  %s289_s1 = inlined_call_operand.vmem [shape: bf16[32,64], index: 1, kind: input, shape index: {}]   ;;  %s290_s0 = inlined_call_operand.vmem [shape: f32[8,32], index: 0, kind: input, shape index: {}]   ;;  %s291_s3 = inlined_call_operand.vmem [shape: bf16[64,2], index: 3, kind: input, shape index: {}]   ;;  %s292_s2 = inlined_call_operand.vmem [shape: f32[1,64], index: 2, kind: input, shape index: {}]   ;;  %s293_s4 = inlined_call_operand.vmem [shape: f32[1,2], index: 4, kind: input, shape index: {}]   ;;  %s294_s5 = inlined_call_operand.vmem [shape: f32[8,2], index: 5, kind: output, shape index: {}]  }
   0x1   :  { %199 = vmatprep.subr.bf16.mxu0 %v227_v0  ;;  %v221_v1 = vld [vmem:[%s289_s1] sm:$0xff]   ;;  %203 = vmatprep.mubr.msk.bf16.mxu0 %vm228_vm0, %v227_v0  ;;  %v222_v2 = vld [vmem:[%s289_s1 + $0x8] sm:$0xff]   ;;  %v225_v7 = vld [vmem:[%s291_s3 + $0x10] sm:$0xff]   ;;  %vm175_vm3 = vcmask 15360  }
   0x2   :  { %207 = vmatprep.subr.bf16.mxu1 %v227_v0  ;;  %215 = vmatprep.mubr.msk.bf16.mxu1 %vm228_vm0, %v227_v0  ;;  %v21_v3 = vld [vmem:[%s290_s0] sm:$0xff]  ;;  %v224_v5 = vld [vmem:[%s291_s3 + $0x8] sm:$0xff]   ;;  %v226_v8 = vld [vmem:[%s291_s3 + $0x18] sm:$0xff]  }
   0x3   :  { %200 = vmatpush3.bf16.msra.mxu0 %v221_v1  ;;  %v223_v4 = vld [vmem:[%s291_s3] sm:$0xff]   ;;  %v22_v6 = vpack.c.bf16 %v21_v3, %v21_v3 }
   0x4   :  { %201 = vmatprep.subr.bf16.mxu0 %v227_v0  ;;  %208 = vmatpush3.bf16.msra.mxu1 %v223_v4  ;;  %v181_v9 = vld [vmem:[%s292_s2] ss:$0 sm:$0xff] }
   0x5   :  { %209 = vmatprep.subr.bf16.mxu1 %v227_v0  ;;  %v185_v17 = vld [vmem:[%s293_s4] ss:$0 sm:$0xff] }
   0x7   :  { %202 = vmatpush3.bf16.msra.mxu0 %v222_v2 }
   0x8   :  { %210 = vmatpush3.bf16.msra.mxu1 %v224_v5 }
   0x9   :  { %211 = vmatprep.subr.bf16.mxu1 %v227_v0 }
   0xa   :  { %204 = vmatmul.mubr.msk.bf16.vlgmr.msra.gmra.mrb[0].mxu0 %vm46_vm1, %v22_v6 }
   0xc   :  { %212 = vmatpush3.bf16.msra.mxu1 %v225_v7 }
   0xd   :  { %213 = vmatprep.subr.bf16.mxu1 %v227_v0 }
  0x10   :  { %214 = vmatpush3.bf16.msra.mxu1 %v226_v8 }
  0xdd   :  { %v84_v10 = vpop.f32.mrb[0].mxu0 }
  0xde   :  { %v85_v11 = vadd.f32 %v181_v9, %v84_v10  ;;  %v205_v12 = vpop.f32.mrb[1].mxu0 }
  0xdf   :  { %v87_v13 = vpop.f32.mrb[2].mxu0 }
  0xe0   :  { %v90_v14 = vmax.f32 %v85_v11, 0.0  ;;  %v206_v15 = vpop.f32.mrb[3].mxu0 }
  0xe2   :  { %v91_v16 = vpack.c.bf16 %v90_v14, %v90_v14 }
  0xe4   :  { %216 = vmatmul.mubr.msk.bf16.vlgmr.msra.gmra.mrb[0].mxu1 %vm131_vm2, %v91_v16 }
 0x1b7   :  { %v169_v18 = vpop.f32.mrb[0].mxu1 }
 0x1b8   :  { %v170_v19 = vadd.f32 %v185_v17, %v169_v18  ;;  %v217_v20 = vpop.f32.mrb[1].mxu1 }
 0x1b9   :  { %v172_v21 = vpop.f32.mrb[2].mxu1 }
 0x1ba   :  { %176 = vst.msk [vmem:[%s294_s5] sm:$0xff] %vm175_vm3, %v170_v19  ;;  %v218_v22 = vpop.f32.mrb[3].mxu1 }

</bundles_post_ra>
